<compile_context>
chip_gen: v7x
topology: tpu7x:2x2x1
jax: 0.10.0
libtpu: 0.0.40
codegen_flags: <defaults>
</compile_context>

<pallas_src>
import functools

import jax
import jax.numpy as jnp
from jax import lax
from jax.experimental import pallas as pl
from jax.experimental.pallas import tpu as pltpu


# ----------------------------- kernel helpers --------------------------------

def _fill_stream(buf_ref, x_ref, m_ref, *, cin, padl, hw, bb):
    """Stack [x*mask ; mask] lane-dense into the haloed stream scratch.

    buf_ref: (2*cin, padl + bb*hw + padl) f32.  Rows [:cin] hold x*mask, rows
    [cin:] hold mask; image bi occupies lanes [padl + bi*hw, padl + (bi+1)*hw).
    The halos only need to be *finite* (validity masks zero every out-of-image
    contribution); zeroing them avoids NaN*0 from uninitialised VMEM.
    """
    n = bb * hw
    buf_ref[:, 0:padl] = jnp.zeros((2 * cin, padl), jnp.float32)
    buf_ref[:, padl + n:padl + n + padl] = jnp.zeros((2 * cin, padl), jnp.float32)
    for bi in range(bb):
        o = padl + bi * hw
        buf_ref[0:cin, o:o + hw] = (x_ref[bi] * m_ref[bi]).astype(jnp.float32)
        buf_ref[cin:2 * cin, o:o + hw] = m_ref[bi].astype(jnp.float32)


def _store_outputs(out_ref, acc, *, cout, hw, bb):
    """acc: (2*cout, bb*hw) f32; rows [:cout] conv output, rows [cout:] new mask."""
    rows = lax.broadcasted_iota(jnp.int32, (2 * cout, 1), 0)
    floor = jnp.where(rows < cout, 0.0, -jnp.inf)      # ReLU on conv rows only
    for bi in range(bb):
        out_ref[bi] = jnp.maximum(acc[:, bi * hw:(bi + 1) * hw],
                                  floor).astype(out_ref.dtype)


# ------------------------------- kernels --------------------------------------

def _pcb_depthwise_kernel(w_ref, vm_ref, x_ref, m_ref, out_ref, buf_ref, *,
                          cin, cout, K, W, hw, padl, bb):
    """VPU fast path for groups == Cin == Cout (icpg == opg == 1).

    w_ref : (K*K, 2*cout, 1)   per-tap per-row weights ([:cout] conv, [cout:] |W|/norm)
    vm_ref: (K*K, 1, bb*hw)    {0,1} tap-validity masks (zero padding + row wrap)
    """
    n = bb * hw
    pad = K // 2
    _fill_stream(buf_ref, x_ref, m_ref, cin=cin, padl=padl, hw=hw, bb=bb)

    acc = jnp.zeros((2 * cout, n), jnp.float32)
    for ky in range(K):                              # 9 taps: short static loop
        for kx in range(K):
            t = ky * K + kx
            s = (ky - pad) * W + (kx - pad)          # tap shift in flattened space
            win = buf_ref[:, padl + s:padl + s + n]  # one shift serves BOTH streams
            acc = acc + w_ref[t] * (win * vm_ref[t])  # per-row broadcast MAC (pure VPU)
    _store_outputs(out_ref, acc, cout=cout, hw=hw, bb=bb)


def _pcb_im2col_kernel(w_ref, vm_ref, x_ref, m_ref, out_ref, buf_ref, slab_ref, *,
                       cin, cout, K, W, hw, padl, bb):
    """General grouped-conv path: im2col slab + ONE MXU matmul per grid step.

    w_ref   : (2*cout, K*K*2*cin)  block-diagonal weights (conv | normalised |W|)
    slab_ref: (K*K*2*cin, bb*hw)   im2col slab scratch
    """
    n = bb * hw
    pad = K // 2
    _fill_stream(buf_ref, x_ref, m_ref, cin=cin, padl=padl, hw=hw, bb=bb)

    # Each tap shift is realised exactly once, fused with its validity-mask
    # multiply, into the slab -- the subsequent single dot reads aligned data.
    for ky in range(K):
        for kx in range(K):
            t = ky * K + kx
            s = (ky - pad) * W + (kx - pad)
            slab_ref[t * 2 * cin:(t + 1) * 2 * cin, :] = (
                buf_ref[:, padl + s:padl + s + n] * vm_ref[t])

    acc = jnp.dot(w_ref[...], slab_ref[...], preferred_element_type=jnp.float32)
    _store_outputs(out_ref, acc, cout=cout, hw=hw, bb=bb)


# ------------------------------- wrapper ---------------------------------------

def pcb_activ_forward(x, mask, weight, groups, *, batch_tile=None):
    """x, mask: (B, Cin, H, W) f32; weight: (Cout, Cin//groups, K, K).

    Returns (h, new_mask), each (B, Cout, H, W).
    """
    # TODO(synk): only the default PCBActiv config is implemented (sample='none-3':
    # 3x3, stride 1, pad 1, no bias, activ='relu'); the stride-2 'down-*' variants
    # and 'leaky' activation are not.
    B, Cin, H, W = x.shape
    Cout, icpg, K, _ = weight.shape
    assert Cin == icpg * groups and Cout % groups == 0
    opg = Cout // groups
    pad = K // 2
    HW = H * W

    if batch_tile is None:
        # Prefer an even grid length (keeps both v7x TensorCores loaded) while
        # folding the rest of the batch into the lane-dense matmul N axis; cap
        # the tile at ~4096 lanes so blocks + double buffering stay well inside
        # v7x's 64 MiB VMEM.
        batch_tile = B // 2 if (B % 2 == 0 and B >= 2) else B
        batch_tile = max(1, min(batch_tile, max(1, 4096 // HW)))
    assert B % batch_tile == 0, "batch_tile must divide the batch"
    bb = batch_tile
    n_cols = bb * HW

    # ---- tiny weight preparation in plain JAX (a few KB) -----------------------
    weight = weight.astype(jnp.float32)
    wabs = jnp.abs(weight)
    ksum = wabs.reshape(Cout, -1).sum(axis=1)
    wnorm = wabs / (ksum + 1e-6)[:, None, None, None]   # fold /(k + 1e-6) into |W|

    depthwise = (icpg == 1 and opg == 1)                # groups == Cin == Cout

    # Per-tap validity masks ({0,1}) in flattened spatial space, tiled over the
    # batch tile so a single (1, bb*HW) row masks the whole lane sweep.
    yy, xx = jnp.meshgrid(jnp.arange(H), jnp.arange(W), indexing="ij")
    vm = []
    for ky in range(K):
        for kx in range(K):
            dy, dx = ky - pad, kx - pad
            ok = (yy + dy >= 0) & (yy + dy < H) & (xx + dx >= 0) & (xx + dx < W)
            vm.append(ok.reshape(HW))
    vmask = jnp.stack(vm, axis=0).astype(jnp.float32)              # (K*K, HW)
    vmask = jnp.tile(vmask, (1, bb)).reshape(K * K, 1, n_cols)     # (K*K, 1, bb*HW)

    # Flatten spatial onto the lane axis (metadata-only reshape, no HBM copy).
    x2 = x.reshape(B, Cin, HW)
    m2 = mask.reshape(B, Cin, HW)

    smax = pad * (W + 1)                    # max |tap shift| in flat space
    padl = ((smax + 127) // 128) * 128      # lane-aligned halo width
    assert padl >= smax

    common_specs = [
        pl.BlockSpec((K * K, 1, n_cols), lambda b: (0, 0, 0)),     # tap masks
        pl.BlockSpec((bb, Cin, HW), lambda b: (b, 0, 0)),          # x
        pl.BlockSpec((bb, Cin, HW), lambda b: (b, 0, 0)),          # mask
    ]
    out_spec = pl.BlockSpec((bb, 2 * Cout, HW), lambda b: (b, 0, 0))
    out_shape = jax.ShapeDtypeStruct((B, 2 * Cout, HW), x.dtype)
    buf_alloc = pltpu.VMEM((2 * Cin, padl + n_cols + padl), jnp.float32)

    if depthwise:
        # (K*K, 2*Cout, 1): per-tap per-channel scalars, conv rows then mask rows.
        w_arr = jnp.concatenate(
            [weight.reshape(Cout, K * K), wnorm.reshape(Cout, K * K)], axis=0)
        w_arr = w_arr.T.reshape(K * K, 2 * Cout, 1)
        kernel = functools.partial(_pcb_depthwise_kernel, cin=Cin, cout=Cout,
                                   K=K, W=W, hw=HW, padl=padl, bb=bb)
        in_specs = ([pl.BlockSpec((K * K, 2 * Cout, 1), lambda b: (0, 0, 0))]
                    + common_specs)
        scratch = [buf_alloc]
    else:
        # Dense block-diagonal (2*Cout, K*K*2*Cin) weights for one im2col dot:
        #   rows [:Cout]  grouped conv weights (columns [t*2Cin, t*2Cin+Cin))
        #   rows [Cout:]  |W|/(sum|W|+1e-6)     (columns [t*2Cin+Cin, (t+1)*2Cin))
        def dense_per_tap(w):  # (Cout, icpg, K, K) -> (K*K, Cout, Cin) block-diag
            d = jnp.zeros((Cout, Cin, K, K), jnp.float32)
            for g in range(groups):
                d = d.at[g * opg:(g + 1) * opg, g * icpg:(g + 1) * icpg].set(
                    w[g * opg:(g + 1) * opg])
            return d.transpose(2, 3, 0, 1).reshape(K * K, Cout, Cin)

        w_taps = jnp.zeros((K * K, 2 * Cout, 2 * Cin), jnp.float32)
        w_taps = w_taps.at[:, :Cout, :Cin].set(dense_per_tap(weight))
        w_taps = w_taps.at[:, Cout:, Cin:].set(dense_per_tap(wnorm))
        w_arr = w_taps.transpose(1, 0, 2).reshape(2 * Cout, K * K * 2 * Cin)
        kernel = functools.partial(_pcb_im2col_kernel, cin=Cin, cout=Cout,
                                   K=K, W=W, hw=HW, padl=padl, bb=bb)
        in_specs = ([pl.BlockSpec((2 * Cout, K * K * 2 * Cin), lambda b: (0, 0))]
                    + common_specs)
        scratch = [buf_alloc,
                   pltpu.VMEM((K * K * 2 * Cin, n_cols), jnp.float32)]

    # NOTE: whole images per grid step are fine at these sizes.  For production
    # H, W add a row-strip spatial grid axis (strip_rows*W a multiple of 128
    # lanes) with a 1-row halo so blocks + double buffering stay inside v7x's
    # 64 MiB VMEM.  If the per-step x/mask DMAs become exposed on the serial
    # grid (v5e/v6e), set pipeline_mode=pl.Buffered(3) on those BlockSpecs.
    combined = pl.pallas_call(
        kernel,
        out_shape=out_shape,
        grid=(B // bb,),
        in_specs=in_specs,
        out_specs=out_spec,
        scratch_shapes=scratch,
        compiler_params=pltpu.CompilerParams(
            dimension_semantics=("parallel",)),   # batch tiles are independent
    )(w_arr, vmask, x2, m2)

    h = combined[:, :Cout, :].reshape(B, Cout, H, W)
    new_mask = combined[:, Cout:, :].reshape(B, Cout, H, W)
    return h, new_mask


# ------------------------------ reference & test -------------------------------

def _reference_forward(x, mask, weight, groups):
    """Pure-JAX reference mirroring the PyTorch forward exactly."""
    dn = lax.conv_dimension_numbers(x.shape, weight.shape, ('NCHW', 'OIHW', 'NCHW'))
    out = lax.conv_general_dilated(
        x * mask, weight, (1, 1), ((1, 1), (1, 1)),
        dimension_numbers=dn, feature_group_count=groups)
    out = jnp.maximum(out, 0.0)
    wabs = jnp.abs(weight)
    k = wabs.reshape(weight.shape[0], -1).sum(axis=1)
    mconv = lax.conv_general_dilated(
        mask, wabs, (1, 1), ((1, 1), (1, 1)),
        dimension_numbers=dn, feature_group_count=groups)
    new_mask = mconv / (k.reshape(1, -1, 1, 1) + 1e-6)
    return out, new_mask


if __name__ == "__main__":
    def run_case(key, B, Cin, Cout, groups, H, W, batch_tile=None):
        K = 3
        kx_, km_, kw_ = jax.random.split(key, 3)
        x = jax.random.normal(kx_, (B, Cin, H, W), jnp.float32)
        mask = (jax.random.uniform(km_, (B, Cin, H, W)) > 0.3).astype(jnp.float32)
        # deterministic xavier-uniform-like init for the grouped 3x3 conv
        fan_in = (Cin // groups) * K * K
        fan_out = (Cout // groups) * K * K
        gain = float(jnp.sqrt(6.0 / (fan_in + fan_out)))
        weight = jax.random.uniform(kw_, (Cout, Cin // groups, K, K), jnp.float32,
                                    minval=-gain, maxval=gain)

        h, h_mask = pcb_activ_forward(x, mask, weight, groups,
                                      batch_tile=batch_tile)
        jax.block_until_ready((h, h_mask))

        h_ref, m_ref = _reference_forward(x, mask, weight, groups)
        assert jnp.allclose(h, h_ref, atol=1e-4), \
            float(jnp.max(jnp.abs(h - h_ref)))
        assert jnp.allclose(h_mask, m_ref, atol=1e-4), \
            float(jnp.max(jnp.abs(h_mask - m_ref)))

    root = jax.random.PRNGKey(0)
    k1, k2 = jax.random.split(root)

    # PCBActiv default config from the spec: groups=4, in_ch=out_ch=4 (one input
    # channel per group) -> depthwise VPU fast path, two batch tiles on the grid.
    run_case(k1, B=2, Cin=4, Cout=4, groups=4, H=16, W=16)

    # General grouped conv (icpg=2) -> single-dot im2col MXU path, whole batch
    # folded into the matmul N axis (batch_tile=2, grid of 1).
    run_case(k2, B=2, Cin=8, Cout=8, groups=4, H=16, W=16, batch_tile=2)

    print("KERNEL_OK")
</pallas_src>

<mosaic_0001>
module attributes {stable_mosaic.version = 11 : i64} {
  func.func @_pcb_depthwise_kernel(%arg0: i32, %arg1: memref<9x8x1xf32, #tpu.memory_space<vmem>>, %arg2: memref<9x1x256xf32, #tpu.memory_space<vmem>>, %arg3: memref<1x4x256xf32, #tpu.memory_space<vmem>>, %arg4: memref<1x4x256xf32, #tpu.memory_space<vmem>>, %arg5: memref<1x8x256xf32, #tpu.memory_space<vmem>>, %arg6: memref<8x512xf32, #tpu.memory_space<vmem>>) attributes {dimension_semantics = [#tpu.dimension_semantics<parallel>], iteration_bounds = array<i64: 2>, scalar_prefetch = 0 : i64, scratch_operands = 1 : i64, tpu.core_type = #tpu.core_type<tc>, window_params = [{pipeline_mode = #tpu.pipeline_mode<synchronous>, transform_indices = @transform_0, window_bounds = array<i64: 9, 8, 1>}, {pipeline_mode = #tpu.pipeline_mode<synchronous>, transform_indices = @transform_1, window_bounds = array<i64: 9, 1, 256>}, {transform_indices = @transform_2, window_bounds = array<i64: 1, 4, 256>}, {transform_indices = @transform_3, window_bounds = array<i64: 1, 4, 256>}, {transform_indices = @transform_4, window_bounds = array<i64: 1, 8, 256>}]} {
    %cst = arith.constant 0.000000e+00 : f32
    %0 = vector.broadcast %cst : f32 to vector<8x128xf32>
    %c0 = arith.constant 0 : index
    %c0_0 = arith.constant 0 : index
    %1 = vector.load %arg6[%c0, %c0_0] : memref<8x512xf32, #tpu.memory_space<vmem>>, vector<8x128xf32>
    tpu.vector_store %arg6[%c0, %c0_0], %0 {strides = array<i32>} : memref<8x512xf32, #tpu.memory_space<vmem>>, vector<8x128xf32>,
    %cst_1 = arith.constant 0.000000e+00 : f32
    %2 = vector.broadcast %cst_1 : f32 to vector<8x128xf32>
    %c0_2 = arith.constant 0 : index
    %c384 = arith.constant 384 : index
    %3 = vector.load %arg6[%c0_2, %c384] : memref<8x512xf32, #tpu.memory_space<vmem>>, vector<8x128xf32>
    tpu.vector_store %arg6[%c0_2, %c384], %2 {strides = array<i32>} : memref<8x512xf32, #tpu.memory_space<vmem>>, vector<8x128xf32>,
    %c0_3 = arith.constant 0 : index
    %c0_4 = arith.constant 0 : index
    %c0_5 = arith.constant 0 : index
    %4 = vector.load %arg3[%c0_3, %c0_4, %c0_5] : memref<1x4x256xf32, #tpu.memory_space<vmem>>, vector<1x4x256xf32>
    %5 = vector.shape_cast %4 : vector<1x4x256xf32> to vector<4x256xf32>
    %c0_6 = arith.constant 0 : index
    %c0_7 = arith.constant 0 : index
    %c0_8 = arith.constant 0 : index
    %6 = vector.load %arg4[%c0_6, %c0_7, %c0_8] : memref<1x4x256xf32, #tpu.memory_space<vmem>>, vector<1x4x256xf32>
    %7 = vector.shape_cast %6 : vector<1x4x256xf32> to vector<4x256xf32>
    %8 = arith.mulf %5, %7 : vector<4x256xf32>
    %c0_9 = arith.constant 0 : index
    %c128 = arith.constant 128 : index
    %9 = vector.load %arg6[%c0_9, %c128] : memref<8x512xf32, #tpu.memory_space<vmem>>, vector<4x256xf32>
    tpu.vector_store %arg6[%c0_9, %c128], %8 {strides = array<i32>} : memref<8x512xf32, #tpu.memory_space<vmem>>, vector<4x256xf32>,
    %c0_10 = arith.constant 0 : index
    %c0_11 = arith.constant 0 : index
    %c0_12 = arith.constant 0 : index
    %10 = vector.load %arg4[%c0_10, %c0_11, %c0_12] : memref<1x4x256xf32, #tpu.memory_space<vmem>>, vector<1x4x256xf32>
    %11 = vector.shape_cast %10 : vector<1x4x256xf32> to vector<4x256xf32>
    %c4 = arith.constant 4 : index
    %c128_13 = arith.constant 128 : index
    %12 = vector.load %arg6[%c4, %c128_13] : memref<8x512xf32, #tpu.memory_space<vmem>>, vector<4x256xf32>
    tpu.vector_store %arg6[%c4, %c128_13], %11 {strides = array<i32>} : memref<8x512xf32, #tpu.memory_space<vmem>>, vector<4x256xf32>,
    %cst_14 = arith.constant 0.000000e+00 : f32
    %13 = vector.broadcast %cst_14 : f32 to vector<8x256xf32>
    %c0_15 = arith.constant 0 : index
    %c111 = arith.constant 111 : index
    %14 = vector.load %arg6[%c0_15, %c111] : memref<8x512xf32, #tpu.memory_space<vmem>>, vector<8x256xf32>
    %c0_16 = arith.constant 0 : index
    %c0_17 = arith.constant 0 : index
    %c0_18 = arith.constant 0 : index
    %15 = vector.load %arg1[%c0_16, %c0_17, %c0_18] : memref<9x8x1xf32, #tpu.memory_space<vmem>>, vector<1x8x1xf32>
    %16 = vector.shape_cast %15 : vector<1x8x1xf32> to vector<8x1xf32>
    %c0_19 = arith.constant 0 : index
    %c0_20 = arith.constant 0 : index
    %c0_21 = arith.constant 0 : index
    %17 = vector.load %arg2[%c0_19, %c0_20, %c0_21] : memref<9x1x256xf32, #tpu.memory_space<vmem>>, vector<1x1x256xf32>
    %18 = vector.shape_cast %17 : vector<1x1x256xf32> to vector<1x256xf32>
    %19 = vector.broadcast %18 : vector<1x256xf32> to vector<8x256xf32>
    %20 = arith.mulf %14, %19 : vector<8x256xf32>
    %21 = vector.broadcast %16 : vector<8x1xf32> to vector<8x256xf32>
    %22 = arith.mulf %21, %20 : vector<8x256xf32>
    %23 = arith.addf %13, %22 : vector<8x256xf32>
    %c0_22 = arith.constant 0 : index
    %c112 = arith.constant 112 : index
    %24 = vector.load %arg6[%c0_22, %c112] : memref<8x512xf32, #tpu.memory_space<vmem>>, vector<8x256xf32>
    %c1 = arith.constant 1 : index
    %c0_23 = arith.constant 0 : index
    %c0_24 = arith.constant 0 : index
    %25 = vector.load %arg1[%c1, %c0_23, %c0_24] : memref<9x8x1xf32, #tpu.memory_space<vmem>>, vector<1x8x1xf32>
    %26 = vector.shape_cast %25 : vector<1x8x1xf32> to vector<8x1xf32>
    %c1_25 = arith.constant 1 : index
    %c0_26 = arith.constant 0 : index
    %c0_27 = arith.constant 0 : index
    %27 = vector.load %arg2[%c1_25, %c0_26, %c0_27] : memref<9x1x256xf32, #tpu.memory_space<vmem>>, vector<1x1x256xf32>
    %28 = vector.shape_cast %27 : vector<1x1x256xf32> to vector<1x256xf32>
    %29 = vector.broadcast %28 : vector<1x256xf32> to vector<8x256xf32>
    %30 = arith.mulf %24, %29 : vector<8x256xf32>
    %31 = vector.broadcast %26 : vector<8x1xf32> to vector<8x256xf32>
    %32 = arith.mulf %31, %30 : vector<8x256xf32>
    %33 = arith.addf %23, %32 : vector<8x256xf32>
    %c0_28 = arith.constant 0 : index
    %c113 = arith.constant 113 : index
    %34 = vector.load %arg6[%c0_28, %c113] : memref<8x512xf32, #tpu.memory_space<vmem>>, vector<8x256xf32>
    %c2 = arith.constant 2 : index
    %c0_29 = arith.constant 0 : index
    %c0_30 = arith.constant 0 : index
    %35 = vector.load %arg1[%c2, %c0_29, %c0_30] : memref<9x8x1xf32, #tpu.memory_space<vmem>>, vector<1x8x1xf32>
    %36 = vector.shape_cast %35 : vector<1x8x1xf32> to vector<8x1xf32>
    %c2_31 = arith.constant 2 : index
    %c0_32 = arith.constant 0 : index
    %c0_33 = arith.constant 0 : index
    %37 = vector.load %arg2[%c2_31, %c0_32, %c0_33] : memref<9x1x256xf32, #tpu.memory_space<vmem>>, vector<1x1x256xf32>
    %38 = vector.shape_cast %37 : vector<1x1x256xf32> to vector<1x256xf32>
    %39 = vector.broadcast %38 : vector<1x256xf32> to vector<8x256xf32>
    %40 = arith.mulf %34, %39 : vector<8x256xf32>
    %41 = vector.broadcast %36 : vector<8x1xf32> to vector<8x256xf32>
    %42 = arith.mulf %41, %40 : vector<8x256xf32>
    %43 = arith.addf %33, %42 : vector<8x256xf32>
    %c0_34 = arith.constant 0 : index
    %c127 = arith.constant 127 : index
    %44 = vector.load %arg6[%c0_34, %c127] : memref<8x512xf32, #tpu.memory_space<vmem>>, vector<8x256xf32>
    %c3 = arith.constant 3 : index
    %c0_35 = arith.constant 0 : index
    %c0_36 = arith.constant 0 : index
    %45 = vector.load %arg1[%c3, %c0_35, %c0_36] : memref<9x8x1xf32, #tpu.memory_space<vmem>>, vector<1x8x1xf32>
    %46 = vector.shape_cast %45 : vector<1x8x1xf32> to vector<8x1xf32>
    %c3_37 = arith.constant 3 : index
    %c0_38 = arith.constant 0 : index
    %c0_39 = arith.constant 0 : index
    %47 = vector.load %arg2[%c3_37, %c0_38, %c0_39] : memref<9x1x256xf32, #tpu.memory_space<vmem>>, vector<1x1x256xf32>
    %48 = vector.shape_cast %47 : vector<1x1x256xf32> to vector<1x256xf32>
    %49 = vector.broadcast %48 : vector<1x256xf32> to vector<8x256xf32>
    %50 = arith.mulf %44, %49 : vector<8x256xf32>
    %51 = vector.broadcast %46 : vector<8x1xf32> to vector<8x256xf32>
    %52 = arith.mulf %51, %50 : vector<8x256xf32>
    %53 = arith.addf %43, %52 : vector<8x256xf32>
    %c0_40 = arith.constant 0 : index
    %c128_41 = arith.constant 128 : index
    %54 = vector.load %arg6[%c0_40, %c128_41] : memref<8x512xf32, #tpu.memory_space<vmem>>, vector<8x256xf32>
    %c4_42 = arith.constant 4 : index
    %c0_43 = arith.constant 0 : index
    %c0_44 = arith.constant 0 : index
    %55 = vector.load %arg1[%c4_42, %c0_43, %c0_44] : memref<9x8x1xf32, #tpu.memory_space<vmem>>, vector<1x8x1xf32>
    %56 = vector.shape_cast %55 : vector<1x8x1xf32> to vector<8x1xf32>
    %c4_45 = arith.constant 4 : index
    %c0_46 = arith.constant 0 : index
    %c0_47 = arith.constant 0 : index
    %57 = vector.load %arg2[%c4_45, %c0_46, %c0_47] : memref<9x1x256xf32, #tpu.memory_space<vmem>>, vector<1x1x256xf32>
    %58 = vector.shape_cast %57 : vector<1x1x256xf32> to vector<1x256xf32>
    %59 = vector.broadcast %58 : vector<1x256xf32> to vector<8x256xf32>
    %60 = arith.mulf %54, %59 : vector<8x256xf32>
    %61 = vector.broadcast %56 : vector<8x1xf32> to vector<8x256xf32>
    %62 = arith.mulf %61, %60 : vector<8x256xf32>
    %63 = arith.addf %53, %62 : vector<8x256xf32>
    %c0_48 = arith.constant 0 : index
    %c129 = arith.constant 129 : index
    %64 = vector.load %arg6[%c0_48, %c129] : memref<8x512xf32, #tpu.memory_space<vmem>>, vector<8x256xf32>
    %c5 = arith.constant 5 : index
    %c0_49 = arith.constant 0 : index
    %c0_50 = arith.constant 0 : index
    %65 = vector.load %arg1[%c5, %c0_49, %c0_50] : memref<9x8x1xf32, #tpu.memory_space<vmem>>, vector<1x8x1xf32>
    %66 = vector.shape_cast %65 : vector<1x8x1xf32> to vector<8x1xf32>
    %c5_51 = arith.constant 5 : index
    %c0_52 = arith.constant 0 : index
    %c0_53 = arith.constant 0 : index
    %67 = vector.load %arg2[%c5_51, %c0_52, %c0_53] : memref<9x1x256xf32, #tpu.memory_space<vmem>>, vector<1x1x256xf32>
    %68 = vector.shape_cast %67 : vector<1x1x256xf32> to vector<1x256xf32>
    %69 = vector.broadcast %68 : vector<1x256xf32> to vector<8x256xf32>
    %70 = arith.mulf %64, %69 : vector<8x256xf32>
    %71 = vector.broadcast %66 : vector<8x1xf32> to vector<8x256xf32>
    %72 = arith.mulf %71, %70 : vector<8x256xf32>
    %73 = arith.addf %63, %72 : vector<8x256xf32>
    %c0_54 = arith.constant 0 : index
    %c143 = arith.constant 143 : index
    %74 = vector.load %arg6[%c0_54, %c143] : memref<8x512xf32, #tpu.memory_space<vmem>>, vector<8x256xf32>
    %c6 = arith.constant 6 : index
    %c0_55 = arith.constant 0 : index
    %c0_56 = arith.constant 0 : index
    %75 = vector.load %arg1[%c6, %c0_55, %c0_56] : memref<9x8x1xf32, #tpu.memory_space<vmem>>, vector<1x8x1xf32>
    %76 = vector.shape_cast %75 : vector<1x8x1xf32> to vector<8x1xf32>
    %c6_57 = arith.constant 6 : index
    %c0_58 = arith.constant 0 : index
    %c0_59 = arith.constant 0 : index
    %77 = vector.load %arg2[%c6_57, %c0_58, %c0_59] : memref<9x1x256xf32, #tpu.memory_space<vmem>>, vector<1x1x256xf32>
    %78 = vector.shape_cast %77 : vector<1x1x256xf32> to vector<1x256xf32>
    %79 = vector.broadcast %78 : vector<1x256xf32> to vector<8x256xf32>
    %80 = arith.mulf %74, %79 : vector<8x256xf32>
    %81 = vector.broadcast %76 : vector<8x1xf32> to vector<8x256xf32>
    %82 = arith.mulf %81, %80 : vector<8x256xf32>
    %83 = arith.addf %73, %82 : vector<8x256xf32>
    %c0_60 = arith.constant 0 : index
    %c144 = arith.constant 144 : index
    %84 = vector.load %arg6[%c0_60, %c144] : memref<8x512xf32, #tpu.memory_space<vmem>>, vector<8x256xf32>
    %c7 = arith.constant 7 : index
    %c0_61 = arith.constant 0 : index
    %c0_62 = arith.constant 0 : index
    %85 = vector.load %arg1[%c7, %c0_61, %c0_62] : memref<9x8x1xf32, #tpu.memory_space<vmem>>, vector<1x8x1xf32>
    %86 = vector.shape_cast %85 : vector<1x8x1xf32> to vector<8x1xf32>
    %c7_63 = arith.constant 7 : index
    %c0_64 = arith.constant 0 : index
    %c0_65 = arith.constant 0 : index
    %87 = vector.load %arg2[%c7_63, %c0_64, %c0_65] : memref<9x1x256xf32, #tpu.memory_space<vmem>>, vector<1x1x256xf32>
    %88 = vector.shape_cast %87 : vector<1x1x256xf32> to vector<1x256xf32>
    %89 = vector.broadcast %88 : vector<1x256xf32> to vector<8x256xf32>
    %90 = arith.mulf %84, %89 : vector<8x256xf32>
    %91 = vector.broadcast %86 : vector<8x1xf32> to vector<8x256xf32>
    %92 = arith.mulf %91, %90 : vector<8x256xf32>
    %93 = arith.addf %83, %92 : vector<8x256xf32>
    %c0_66 = arith.constant 0 : index
    %c145 = arith.constant 145 : index
    %94 = vector.load %arg6[%c0_66, %c145] : memref<8x512xf32, #tpu.memory_space<vmem>>, vector<8x256xf32>
    %c8 = arith.constant 8 : index
    %c0_67 = arith.constant 0 : index
    %c0_68 = arith.constant 0 : index
    %95 = vector.load %arg1[%c8, %c0_67, %c0_68] : memref<9x8x1xf32, #tpu.memory_space<vmem>>, vector<1x8x1xf32>
    %96 = vector.shape_cast %95 : vector<1x8x1xf32> to vector<8x1xf32>
    %c8_69 = arith.constant 8 : index
    %c0_70 = arith.constant 0 : index
    %c0_71 = arith.constant 0 : index
    %97 = vector.load %arg2[%c8_69, %c0_70, %c0_71] : memref<9x1x256xf32, #tpu.memory_space<vmem>>, vector<1x1x256xf32>
    %98 = vector.shape_cast %97 : vector<1x1x256xf32> to vector<1x256xf32>
    %99 = vector.broadcast %98 : vector<1x256xf32> to vector<8x256xf32>
    %100 = arith.mulf %94, %99 : vector<8x256xf32>
    %101 = vector.broadcast %96 : vector<8x1xf32> to vector<8x256xf32>
    %102 = arith.mulf %101, %100 : vector<8x256xf32>
    %103 = arith.addf %93, %102 : vector<8x256xf32>
    %104 = tpu.iota {dimensions = array<i32: 0>} : vector<8x1xi32>
    %c4_i32 = arith.constant 4 : i32
    %105 = vector.broadcast %c4_i32 : i32 to vector<8x1xi32>
    %106 = arith.cmpi slt, %104, %105 : vector<8x1xi32>
    %cst_72 = arith.constant 0.000000e+00 : f32
    %cst_73 = arith.constant 0xFF800000 : f32
    %107 = vector.broadcast %cst_72 : f32 to vector<8x1xf32>
    %108 = vector.broadcast %cst_73 : f32 to vector<8x1xf32>
    %109 = arith.select %106, %107, %108 : vector<8x1xi1>, vector<8x1xf32>
    %110 = vector.broadcast %109 : vector<8x1xf32> to vector<8x256xf32>
    %111 = arith.maximumf %103, %110 : vector<8x256xf32>
    %c0_74 = arith.constant 0 : index
    %c0_75 = arith.constant 0 : index
    %c0_76 = arith.constant 0 : index
    %112 = vector.load %arg5[%c0_74, %c0_75, %c0_76] : memref<1x8x256xf32, #tpu.memory_space<vmem>>, vector<1x8x256xf32>
    %113 = vector.shape_cast %112 : vector<1x8x256xf32> to vector<8x256xf32>
    %114 = vector.shape_cast %111 : vector<8x256xf32> to vector<1x8x256xf32>
    tpu.vector_store %arg5[%c0_74, %c0_75, %c0_76], %114 {strides = array<i32>} : memref<1x8x256xf32, #tpu.memory_space<vmem>>, vector<1x8x256xf32>,
    return
  }
  func.func @transform_0(%arg0: i32) -> (i32, i32, i32) {
    %c0_i32 = arith.constant 0 : i32
    %c0_i32_0 = arith.constant 0 : i32
    %c0_i32_1 = arith.constant 0 : i32
    %c0_i32_2 = arith.constant 0 : i32
    return %c0_i32, %c0_i32_0, %c0_i32_1 : i32, i32, i32
  }
  func.func @transform_1(%arg0: i32) -> (i32, i32, i32) {
    %c0_i32 = arith.constant 0 : i32
    %c0_i32_0 = arith.constant 0 : i32
    %c0_i32_1 = arith.constant 0 : i32
    %c0_i32_2 = arith.constant 0 : i32
    return %c0_i32, %c0_i32_0, %c0_i32_1 : i32, i32, i32
  }
  func.func @transform_2(%arg0: i32) -> (i32, i32, i32) {
    %c0_i32 = arith.constant 0 : i32
    %c0_i32_0 = arith.constant 0 : i32
    %c0_i32_1 = arith.constant 0 : i32
    return %arg0, %c0_i32, %c0_i32_0 : i32, i32, i32
  }
  func.func @transform_3(%arg0: i32) -> (i32, i32, i32) {
    %c0_i32 = arith.constant 0 : i32
    %c0_i32_0 = arith.constant 0 : i32
    %c0_i32_1 = arith.constant 0 : i32
    return %arg0, %c0_i32, %c0_i32_0 : i32, i32, i32
  }
  func.func @transform_4(%arg0: i32) -> (i32, i32, i32) {
    %c0_i32 = arith.constant 0 : i32
    %c0_i32_0 = arith.constant 0 : i32
    %c0_i32_1 = arith.constant 0 : i32
    return %arg0, %c0_i32, %c0_i32_0 : i32, i32, i32
  }
}

</mosaic_0001>

<bundles_post_ra>
// kernel: tpu_custom_call.1
= control target key start
LH: loop header
LB: loop body
LE: loop exit
PB: predicated region body
PF: predicated region fallthrough
CT: control target
= control target key end

     0   :  { %9 = vsyncpa [#allocation4], 0  ;;  %s1206_s0 = inlined_call_operand.vmem [shape: f32[9,8,1], index: 0, kind: input, shape index: {}]   ;;  %s1207_s1 = inlined_call_operand.vmem [shape: f32[9,1,256], index: 1, kind: input, shape index: {}]   ;;  %s1208_s2 = inlined_call_operand.vmem [shape: f32[2,4,256], index: 2, kind: input, shape index: {}]   ;;  %s1209_s3 = inlined_call_operand.vmem [shape: f32[2,4,256], index: 3, kind: input, shape index: {}]   ;;  %s1210_s4 = inlined_call_operand.hbm [shape: f32[2,8,256], index: 4, kind: output, shape index: {}]  }
   0x1   :  { %11 = vsyncpa [#allocation4 + $0x1], 0  ;;  %s968_s15 = smov 0   ;;  %s970_s16 = smov 0  }
   0x2   :  { %s972_s17 = smov 0   ;;  %s974_s18 = smov 0  }
   0x3 LB: > { %s989_s19 = sadd.s32 4294967295, %s925_s18   ;;  %s772_s20 = sadd.s32 4294967294, %s925_s18   ;;  %s925_s18 = sphi %s974_s18, %s1216_s18   ;;  %s921_s17 = sphi %s972_s17, %s1215_s17   ;;  %s917_s16 = sphi %s970_s16, %s1214_s16   ;;  %s913_s15 = sphi %s968_s15, %s1213_s15  }
   0x4   : > { %s993_s21 = sadd.s32 1, %s925_s18   ;;  %s118_s22 = sadd.s32 1, %s921_s17 }
   0x5   : > { %s115_s23 = ssub.s32 %s925_s18, %s993_s21  ;;  %p128_p0 = scmp.ne.s32.totalorder %s921_s17, %s917_s16 }
   0x6   : > { %p116_p1 = scmp.eq.s32.totalorder %s115_s23, 0  ;;  %p129_p2 = scmp.eq.s32.totalorder %s989_s19, 1 }
   0x7   : > { %p134_p3 = scmp.ne.s32.totalorder %s917_s16, %s913_s15  ;;  %p135_p4 = scmp.eq.s32.totalorder %s772_s20, 1 }
   0x8   : > { %s1004_s24 = scalar_select %p116_p1, %s921_s17, %s118_s22  }
   0x9   : > { %p1006_p5 = por %p129_p2, %p128_p0  ;;  %p1010_p6 = por %p135_p4, %p134_p3 }
   0xa   : > { %p775_p7 = scmp.ge.s32.totalorder %s925_s18, 1  ;;  %p175_p8 = scmp.lt.s32.totalorder %s925_s18, 3 }
   0xc   : > { %p176_p9 = pnand %p775_p7, %p175_p8 }
   0xd   : > { %v781_v0 = vld [vmem:[%s1206_s0 + $0x8] sm:$0xff] (!%p176_p9)  ;;  %v238_v1 = vlaneseq (!%p176_p9)  ;;  %v927_v2 = vmov (!%p176_p9), 0   ;;  %v783_v4 = vld [vmem:[%s1206_s0 + $0x10] sm:$0xff] (!%p176_p9)  ;;  %v782_v5 = vld [vmem:[%s1207_s1 + $0x2] sm:$0x3] (!%p176_p9)  ;;  %p206_p10 = scmp.lt.s32.totalorder (!%p176_p9), %s989_s19, 1 }
   0xe   : > { %179 = sbr.rel (%p176_p9) target bundleno = 448 (0x1c0), region = 36  ;;  %860 = vset.pattern.permute.xlu0 (!%p176_p9), %v927_v2  ;;  %861 = vset.pattern.permute.xlu1 (!%p176_p9), %v927_v2  ;;  %v785_v9 = vld [vmem:[%s1206_s0 + $0x18] sm:$0xff] (!%p176_p9)  ;;  %v784_v10 = vld [vmem:[%s1207_s1 + $0x4] sm:$0x3] (!%p176_p9)  ;;  %s928_s11 = smov (!%p176_p9), 112   ;;  %v789_v22 = vld [vmem:[%s1206_s0 + $0x28] sm:$0xff] (!%p176_p9) }
   0xf   : > { %296 = vperm.xlu0 (!%p176_p9), %860, %v781_v0   ;;  %v1019_v3 = vshrl.u32 (!%p176_p9), %v238_v1, 7  ;;  %v786_v13 = vld [vmem:[%s1207_s1 + $0x6] sm:$0x3] (!%p176_p9)  ;;  %s929_s5 = smov (!%p176_p9), 113   ;;  %s930_s8 = smov (!%p176_p9), 127   ;;  %v791_v26 = vld [vmem:[%s1206_s0 + $0x30] sm:$0xff] (!%p176_p9) }
  0x10   : > { %v787_v21 = vld [vmem:[%s1206_s0 + $0x20] sm:$0xff] (!%p176_p9)  ;;  %v790_v23 = vld [vmem:[%s1207_s1 + $0xa] sm:$0x3] (!%p176_p9)  ;;  %s931_s22 = smov (!%p176_p9), 1   ;;  %v793_v27 = vld [vmem:[%s1206_s0 + $0x38] sm:$0xff] (!%p176_p9)  ;;  %s932_s6 = smov (!%p176_p9), 15  }
  0x11   : > { %v1028_v6 = vsub.s32 (!%p176_p9), 0, %v1019_v3  ;;  %v1031_v7 = vsub.s32 (!%p176_p9), 1, %v1019_v3  ;;  %v792_v28 = vld [vmem:[%s1207_s1 + $0xc] sm:$0x3] (!%p176_p9)  ;;  %v794_v31 = vld [vmem:[%s1207_s1 + $0xe] sm:$0x3] (!%p176_p9) }
  0x12   : > { %v796_v34 = vld [vmem:[%s1207_s1 + $0x10] sm:$0x3] (!%p176_p9)  ;;  %v795_v35 = vld [vmem:[%s1206_s0 + $0x40] sm:$0xff] (!%p176_p9)  ;;  %s934_s14 = smov (!%p176_p9), 17   ;;  %s935_s28 = smov (!%p176_p9), 111   ;;  %vm286_vm0 = vcmask (!%p176_p9), 916480  }
  0x13   : > { %347 = vperm.xlu0 (!%p176_p9), %860, %v783_v4   ;;  %v277_v8 = vrot.slane (!%p176_p9), %v782_v5, %v1028_v6  ;;  %v281_v11 = vrot.slane (!%p176_p9), %v782_v5, %v1031_v7  ;;  %v332_v12 = vrot.slane (!%p176_p9), %v784_v10, %v1031_v7  ;;  %v328_v14 = vrot.slane (!%p176_p9), %v784_v10, %v1028_v6  ;;  %v235_v38 = vld [vmem:[%s1206_s0] sm:$0xff] (!%p176_p9)  ;;  %s936_s29 = smov (!%p176_p9), 126   ;;  %v788_v5 = vld [vmem:[%s1207_s1 + $0x8] sm:$0x3] (!%p176_p9)  ;;  %s940_s7 = smov (!%p176_p9), 94  }
  0x14   : > { %v379_v19 = vrot.slane (!%p176_p9), %v786_v13, %v1028_v6  ;;  %v383_v24 = vrot.slane (!%p176_p9), %v786_v13, %v1031_v7  ;;  %v468_v25 = vrot.slane (!%p176_p9), %v790_v23, %v1028_v6  ;;  %v472_v29 = vrot.slane (!%p176_p9), %v790_v23, %v1031_v7  ;;  %v236_v39 = vld [vmem:[%s1207_s1] sm:$0x3] (!%p176_p9)  ;;  %s203_s9 = sand.u32 (!%p176_p9), 1, %s917_s16  }
  0x15   : > { %282 = vrot.lane.b32.xlu1 %v277_v8, %s928_s11  ;;  %s207_s12 = scalar_select %p206_p10, %s989_s19, 1  ;;  %v523_v30 = vrot.slane %v792_v28, %v1031_v7  ;;  %v519_v32 = vrot.slane %v792_v28, %v1028_v6  ;;  %v570_v33 = vrot.slane %v794_v31, %v1028_v6  ;;  %v621_v36 = vrot.slane %v796_v34, %v1028_v6 }
  0x16   : > { %v574_v37 = vrot.slane %v794_v31, %v1031_v7  ;;  %v625_v40 = vrot.slane %v796_v34, %v1031_v7  ;;  %v245_v41 = vrot.slane %v236_v39, %v1031_v7  ;;  %v241_v42 = vrot.slane %v236_v39, %v1028_v6  ;;  %s776_s10 = sshll.u32 %s203_s9, 4 }
  0x17   : > { %397 = vperm.xlu0 %860, %v785_v9   ;;  %s802_s13 = sshll.u32 %s207_s12, 3  ;;  %vm337_vm1 = vcmask 924672   ;;  %vm311_vm2 = vcmask 1039360   ;;  %vm477_vm3 = vcmask 7168   ;;  %vm528_vm4 = vcmask 121856   ;;  %s804_s12 = sshll.u32 %s989_s19, 8 }
  0x18   : > { %s210_s27 = scalar_lea.vmem %s1208_s2, %s802_s13  ;;  %s215_s30 = scalar_lea.vmem %s1209_s3, %s802_s13  ;;  %vm579_vm5 = vcmask 130048   ;;  %vm630_vm6 = vcmask 138240   ;;  %vm250_vm7 = vcmask 908288   ;;  %vm362_vm8 = vcmask 1031168  }
  0x19   : > { %284 = vrot.lane.b32.xlu1 %v281_v11, %s928_s11  ;;  %v218_v15 = vld [vmem:[%s210_s27] sm:$0xff]  ;;  %s933_s13 = smov 16   ;;  %v432_v11 = vrot.slane %v788_v5, %v1031_v7  ;;  %vm502_vm9 = vcmask 900096   ;;  %vm553_vm10 = vcmask 785408   ;;  %vm666_vm11 = vcmp.lt.s32.totalorder %v1019_v3, 4  ;;  %s1162_s27 = scalar_lea.hbm %s1210_s4, %s804_s12 }
  0x1a   : > { %v219_v16 = vld [vmem:[%s215_s30] sm:$0xff]  ;;  %vm604_vm12 = vcmask 777216   ;;  %vm655_vm13 = vcmask 769024   ;;  %s687_s19 = scalar_lea.sflag [#allocation4], %s203_s9 }
  0x1b   : > { %v220_v17 = vmul.f32 %v219_v16, %v218_v15  ;;  %v228_v18 = vcombine.low %v219_v16, %v219_v16  ;;  %231 = vst [vmem:[#allocation2 + $0x10] sm:$0xf0] %v219_v16  ;;  %335 = vrot.lane.b32.xlu0 %v332_v12, %s929_s5  ;;  %v428_v12 = vrot.slane %v788_v5, %v1028_v6 }
  0x1d   : > { %v222_v20 = vcombine.high %v220_v17, %v220_v17  ;;  %224 = vst [vmem:[#allocation2 + $0x8] sm:$0xf] %v220_v17  ;;  %230 = vst [vmem:[#allocation2 + $0x8] sm:$0xf0] %v228_v18  ;;  %333 = vrot.lane.b32.xlu1 %v328_v14, %s929_s5 }
  0x1f   : > { %225 = vst [vmem:[#allocation2 + $0x10] sm:$0xf] %v222_v20  ;;  %384 = vrot.lane.b32.xlu0 %v379_v19, %s930_s8 }
  0x21   : > { %439 = vperm.xlu1 %861, %v787_v21  }
  0x23   : > { %487 = vperm.xlu0 %860, %v789_v22  }
  0x24   : > { %v1107_v44 = vld [vmem:[#allocation2 + $0x8] sm:$0xff] }
  0x25   : > { %386 = vrot.lane.b32.xlu1 %v383_v24, %s930_s8  ;;  %v435_v20 = vmul.f32 %v428_v12, %v1107_v44 }
  0x26   : > { %v1109_v46 = vld [vmem:[#allocation2 + $0x10] sm:$0xff] }
  0x27   : > { %473 = vrot.lane.b32.xlu0 %v468_v25, %s931_s22  ;;  %v436_v18 = vmul.f32 %v432_v11, %v1109_v46 }
  0x29   : > { %538 = vperm.xlu1 %861, %v791_v26  }
  0x2b   : > { %589 = vperm.xlu0 %860, %v793_v27  }
  0x2d   : > { %475 = vrot.lane.b32.xlu1 %v472_v29, %s931_s22 }
  0x2f   : > { %526 = vrot.lane.b32.xlu0 %v523_v30, %s932_s6 }
  0x31   : > { %524 = vrot.lane.b32.xlu1 %v519_v32, %s932_s6  ;;  %s939_s6 = smov 95  }
  0x33   : > { %575 = vrot.lane.b32.xlu0 %v570_v33, %s933_s13 }
  0x35   : > { %640 = vperm.xlu1 %861, %v795_v35  }
  0x37   : > { %626 = vrot.lane.b32.xlu0 %v621_v36, %s934_s14 }
  0x39   : > { %577 = vrot.lane.b32.xlu1 %v574_v37, %s933_s13  ;;  %s205_s13 = scalar_lea.vmem [#allocation3], %s776_s10 }
  0x3a   : > { %s701_s20 = sshll.u32 %s205_s13, 4  ;;  %s1164_s20 = int_to_ptr.vmem [resolvable:$true] %s701_s20 }
  0x3b   : > { %260 = vperm.xlu0 %860, %v235_v38  }
  0x3d   : > { %628 = vrot.lane.b32.xlu1 %v625_v40, %s934_s14 }
  0x3f   : > { %248 = vrot.lane.b32.xlu0 %v245_v41, %s935_s28 }
  0x41   : > { %246 = vrot.lane.b32.xlu1 %v241_v42, %s935_s28 }
  0x87   : > { %v283_v43 = vpop.permute.xlu1 %282 }
  0x88   : > { %v291_v48 = vmul.f32 0.0, %v283_v43 }
  0x8b   : > { %v285_v45 = vpop.permute.xlu1 %284 }
  0x8c   : > { %v287_v47 = vsel %vm286_vm0, %v283_v43, %v285_v45  ;;  %v293_v51 = vmul.f32 %v285_v45, %v1109_v46 }
  0x8d   : > { %v292_v49 = vmul.f32 %v287_v47, %v1107_v44 }
  0x8e   : > { %v297_v50 = vpop.permute.xlu0 %296 }
  0x8f   : > { %v299_v52 = vmul.f32 %v297_v50, %v291_v48  ;;  %v300_v53 = vmul.f32 %v297_v50, %v292_v49  ;;  %v334_v54 = vpop.permute.xlu1 %333  ;;  %v301_v57 = vmul.f32 %v297_v50, %v293_v51 }
  0x90   : > { %v342_v55 = vmul.f32 0.0, %v334_v54 }
  0x91   : > { %305 = vrot.lane.b32.xlu1 %v299_v52, %s930_s8  ;;  %307 = vrot.lane.b32.xlu0 %v300_v53, %s930_s8 }
  0x92   : > { %v348_v56 = vpop.permute.xlu0 %347 }
  0x93   : > { %v350_v58 = vmul.f32 %v348_v56, %v342_v55 }
  0x95   : > { %356 = vrot.lane.b32.xlu0 %v350_v58, %s936_s29  ;;  %309 = vrot.lane.b32.xlu1 %v301_v57, %s930_s8  ;;  %s938_s8 = smov 96  }
  0x96   : > { %v398_v59 = vpop.permute.xlu0 %397 }
  0x9a   : > { %v336_v60 = vpop.permute.xlu0 %335 }
  0x9b   : > { %v338_v61 = vsel %vm337_vm1, %v334_v54, %v336_v60  ;;  %v344_v62 = vmul.f32 %v336_v60, %v1109_v46 }
  0x9c   : > { %v343_v63 = vmul.f32 %v338_v61, %v1107_v44 }
  0x9d   : > { %v352_v0 = vmul.f32 %v348_v56, %v344_v62 }
  0x9e   : > { %v385_v1 = vpop.permute.xlu0 %384  ;;  %v351_v2 = vmul.f32 %v348_v56, %v343_v63 }
  0x9f   : > { %v392_v4 = vmul.f32 0.0, %v385_v1  ;;  %360 = vrot.lane.b32.xlu0 %v352_v0, %s936_s29 }
  0xa0   : > { %v440_v8 = vpop.permute.xlu1 %439  ;;  %358 = vrot.lane.b32.xlu1 %v351_v2, %s936_s29 }
  0xa1   : > { %v400_v9 = vmul.f32 %v398_v59, %v392_v4  ;;  %v443_v7 = vmul.f32 %v440_v8, %v436_v18  ;;  %v442_v23 = vmul.f32 %v440_v8, %v435_v20 }
  0xa2   : > { %v488_v10 = vpop.permute.xlu0 %487 }
  0xa4   : > { %v387_v13 = vpop.permute.xlu1 %386  ;;  %406 = vrot.lane.b32.xlu1 %v400_v9, %s928_s11 }
  0xa5   : > { %v388_v14 = vsel %vm311_vm2, %v385_v1, %v387_v13  ;;  %v394_v15 = vmul.f32 %v387_v13, %v1109_v46 }
  0xa6   : > { %v393_v16 = vmul.f32 %v388_v14, %v1107_v44  ;;  %v474_v17 = vpop.permute.xlu0 %473 }
  0xa7   : > { %v402_v19 = vmul.f32 %v398_v59, %v394_v15  ;;  %v482_v24 = vmul.f32 %v474_v17, %v1107_v44 }
  0xa8   : > { %v539_v21 = vpop.permute.xlu1 %538  ;;  %v401_v22 = vmul.f32 %v398_v59, %v393_v16 }
  0xa9   : > { %410 = vrot.lane.b32.xlu1 %v402_v19, %s928_s11  ;;  %v490_v29 = vmul.f32 %v488_v10, %v482_v24 }
  0xaa   : > { %v590_v6 = vpop.permute.xlu0 %589  ;;  %408 = vrot.lane.b32.xlu0 %v401_v22, %s928_s11  ;;  %s937_s11 = smov 110  }
  0xac   : > { %v476_v25 = vpop.permute.xlu1 %475 }
  0xad   : > { %v478_v26 = vsel %vm477_vm3, %v474_v17, %v476_v25  ;;  %448 = vrot.lane.b32.xlu1 %v443_v7, %s935_s28  ;;  %v484_v30 = vmul.f32 0.0, %v476_v25 }
  0xae   : > { %v483_v27 = vmul.f32 %v478_v26, %v1109_v46  ;;  %v527_v28 = vpop.permute.xlu0 %526  ;;  %446 = vrot.lane.b32.xlu0 %v442_v23, %s935_s28  ;;  %s942_s28 = smov [#allocation3]  }
  0xaf   : > { %v492_v37 = vmul.f32 %v488_v10, %v484_v30  ;;  %v535_v38 = vmul.f32 0.0, %v527_v28  ;;  %s867_s29 = sshll.u32 %s942_s28, 4  ;;  %s868_s29 = int_to_ptr.vmem [resolvable:$false] %s867_s29 }
  0xb0   : > { %v525_v31 = vpop.permute.xlu1 %524  ;;  %v491_v32 = vmul.f32 %v488_v10, %v483_v27  ;;  %s869_s30 = scalar_lea.vmem %s868_s29, 512  ;;  %p870_p0 = scmp.lt.s32.totalorder %s1164_s20, %s868_s29 }
  0xb1   : > { %v529_v33 = vsel %vm528_vm4, %v525_v31, %v527_v28  ;;  %v533_v34 = vmul.f32 %v525_v31, %v1107_v44  ;;  %v543_v41 = vmul.f32 %v539_v21, %v535_v38 }
  0xb2   : > { %496 = vrot.lane.b32.xlu0 %v490_v29, %s937_s11  ;;  %498 = vrot.lane.b32.xlu1 %v491_v32, %s937_s11  ;;  %v576_v36 = vpop.permute.xlu0 %575  ;;  %v534_v39 = vmul.f32 %v529_v33, %v1109_v46 }
  0xb3   : > { %v541_v35 = vmul.f32 %v539_v21, %v533_v34  ;;  %v584_v42 = vmul.f32 %v576_v36, %v1107_v44 }
  0xb4   : > { %v641_v40 = vpop.permute.xlu1 %640  ;;  %v542_v45 = vmul.f32 %v539_v21, %v534_v39 }
  0xb5   : > { %v592_v50 = vmul.f32 %v590_v6, %v584_v42 }
  0xb6   : > { %500 = vrot.lane.b32.xlu0 %v492_v37, %s937_s11  ;;  %547 = vrot.lane.b32.xlu1 %v541_v35, %s938_s8  ;;  %v627_v47 = vpop.permute.xlu0 %626 }
  0xb7   : > { %v635_v51 = vmul.f32 %v627_v47, %v1107_v44 }
  0xb8   : > { %v578_v43 = vpop.permute.xlu1 %577 }
  0xb9   : > { %v580_v48 = vsel %vm579_vm5, %v576_v36, %v578_v43  ;;  %v586_v52 = vmul.f32 0.0, %v578_v43  ;;  %v643_v56 = vmul.f32 %v641_v40, %v635_v51 }
  0xba   : > { %v585_v49 = vmul.f32 %v580_v48, %v1109_v46  ;;  %549 = vrot.lane.b32.xlu0 %v542_v45, %s938_s8  ;;  %551 = vrot.lane.b32.xlu1 %v543_v41, %s938_s8  ;;  %v261_v62 = vpop.permute.xlu0 %260 }
  0xbb   : > { %v594_v57 = vmul.f32 %v590_v6, %v586_v52 }
  0xbc   : > { %v629_v53 = vpop.permute.xlu1 %628  ;;  %v593_v54 = vmul.f32 %v590_v6, %v585_v49 }
  0xbd   : > { %v631_v55 = vsel %vm630_vm6, %v627_v47, %v629_v53  ;;  %v637_v59 = vmul.f32 0.0, %v629_v53 }
  0xbe   : > { %598 = vrot.lane.b32.xlu0 %v592_v50, %s939_s6  ;;  %600 = vrot.lane.b32.xlu1 %v593_v54, %s939_s6  ;;  %v636_v58 = vmul.f32 %v631_v55, %v1109_v46  ;;  %v249_v1 = vpop.permute.xlu0 %248 }
  0xbf   : > { %v645_v60 = vmul.f32 %v641_v40, %v637_v59  ;;  %v257_v6 = vmul.f32 %v249_v1, %v1109_v46 }
  0xc0   : > { %v644_v61 = vmul.f32 %v641_v40, %v636_v58  ;;  %v247_v63 = vpop.permute.xlu1 %246 }
  0xc1   : > { %v255_v13 = vmul.f32 0.0, %v247_v63  ;;  %v251_v17 = vsel %vm250_vm7, %v247_v63, %v249_v1  ;;  %v265_v30 = vmul.f32 %v261_v62, %v257_v6 }
  0xc2   : > { %602 = vrot.lane.b32.xlu0 %v594_v57, %s939_s6  ;;  %649 = vrot.lane.b32.xlu1 %v643_v56, %s940_s7  ;;  %v256_v7 = vmul.f32 %v251_v17, %v1107_v44  ;;  %v941_v57 = vmov -inf  }
  0xc3   : > { %v263_v18 = vmul.f32 %v261_v62, %v255_v13  ;;  %v667_v58 = vsel %vm666_vm11, 0.0, %v941_v57 }
  0xc4   : > { %v264_v29 = vmul.f32 %v261_v62, %v256_v7 }
  0xc6   : > { %651 = vrot.lane.b32.xlu0 %v644_v61, %s940_s7  ;;  %653 = vrot.lane.b32.xlu1 %v645_v60, %s940_s7 }
 0x103   : > { %v306_v0 = vpop.permute.xlu1 %305  ;;  %v308_v2 = vpop.permute.xlu0 %307 }
 0x104   : > { %v312_v16 = vsel %vm311_vm2, %v306_v0, %v308_v2 }
 0x105   : > { %v317_v22 = vadd.f32 %v312_v16, %v263_v18 }
 0x107   : > { %v310_v4 = vpop.permute.xlu1 %309  ;;  %v357_v8 = vpop.permute.xlu0 %356 }
 0x108   : > { %v313_v27 = vsel %vm311_vm2, %v308_v2, %v310_v4  ;;  %v319_v33 = vadd.f32 %v310_v4, %v265_v30 }
 0x109   : > { %v318_v32 = vadd.f32 %v313_v27, %v264_v29 }
 0x111   : > { %v361_v10 = vpop.permute.xlu0 %360 }
 0x112   : > { %v359_v5 = vpop.permute.xlu1 %358  ;;  %v370_v44 = vadd.f32 %v361_v10, %v319_v33 }
 0x113   : > { %v363_v19 = vsel %vm362_vm8, %v357_v8, %v359_v5  ;;  %v364_v31 = vsel %vm362_vm8, %v359_v5, %v361_v10 }
 0x114   : > { %v368_v24 = vadd.f32 %v363_v19, %v317_v22  ;;  %v369_v37 = vadd.f32 %v364_v31, %v318_v32 }
 0x116   : > { %v407_v9 = vpop.permute.xlu1 %406 }
 0x11b   : > { %v411_v11 = vpop.permute.xlu1 %410 }
 0x11c   : > { %v409_v12 = vpop.permute.xlu0 %408  ;;  %v419_v40 = vadd.f32 %v411_v11, %v370_v44 }
 0x11d   : > { %v412_v23 = vsel %vm286_vm0, %v407_v9, %v409_v12  ;;  %v413_v46 = vsel %vm286_vm0, %v409_v12, %v411_v11 }
 0x11e   : > { %v417_v28 = vadd.f32 %v412_v23, %v368_v24  ;;  %v418_v41 = vadd.f32 %v413_v46, %v369_v37 }
 0x11f   : > { %v449_v14 = vpop.permute.xlu1 %448 }
 0x120   : > { %v447_v15 = vpop.permute.xlu0 %446  ;;  %v456_v49 = vadd.f32 %v449_v14, %v419_v40 }
 0x121   : > { %v454_v36 = vadd.f32 %v447_v15, %v417_v28  ;;  %v450_v38 = vsel %vm250_vm7, %v447_v15, %v449_v14 }
 0x122   : > { %v455_v50 = vadd.f32 %v450_v38, %v418_v41 }
 0x124   : > { %v497_v20 = vpop.permute.xlu0 %496  ;;  %v499_v21 = vpop.permute.xlu1 %498 }
 0x125   : > { %v508_v39 = vadd.f32 %v497_v20, %v454_v36  ;;  %v503_v45 = vsel %vm502_vm9, %v497_v20, %v499_v21 }
 0x126   : > { %v509_v54 = vadd.f32 %v503_v45, %v455_v50 }
 0x128   : > { %v501_v25 = vpop.permute.xlu0 %500  ;;  %v548_v26 = vpop.permute.xlu1 %547 }
 0x129   : > { %v504_v47 = vsel %vm502_vm9, %v499_v21, %v501_v25  ;;  %v559_v48 = vadd.f32 %v548_v26, %v508_v39 }
 0x12a   : > { %v510_v55 = vadd.f32 %v504_v47, %v456_v49 }
 0x12c   : > { %v550_v34 = vpop.permute.xlu0 %549  ;;  %v552_v35 = vpop.permute.xlu1 %551 }
 0x12d   : > { %v554_v51 = vsel %vm553_vm10, %v548_v26, %v550_v34  ;;  %v555_v52 = vsel %vm553_vm10, %v550_v34, %v552_v35 }
 0x12e   : > { %v560_v63 = vadd.f32 %v554_v51, %v509_v54  ;;  %v561_v3 = vadd.f32 %v555_v52, %v510_v55 }
 0x130   : > { %v599_v42 = vpop.permute.xlu0 %598  ;;  %v601_v43 = vpop.permute.xlu1 %600 }
 0x131   : > { %v610_v53 = vadd.f32 %v599_v42, %v559_v48  ;;  %v605_v60 = vsel %vm604_vm12, %v599_v42, %v601_v43 }
 0x132   : > { %v611_v1 = vadd.f32 %v605_v60, %v560_v63 }
 0x134   : > { %v603_v56 = vpop.permute.xlu0 %602  ;;  %v650_v59 = vpop.permute.xlu1 %649 }
 0x135   : > { %v606_v61 = vsel %vm604_vm12, %v601_v43, %v603_v56  ;;  %v661_v62 = vadd.f32 %v650_v59, %v610_v53 }
 0x136   : > { %v612_v2 = vadd.f32 %v606_v61, %v561_v3 }
 0x137   : > { %v668_v0 = vmax.f32 %v661_v62, %v667_v58 }
 0x138   : > { %v652_v4 = vpop.permute.xlu0 %651  ;;  %v654_v5 = vpop.permute.xlu1 %653 }
 0x139   : > { %v656_v8 = vsel %vm655_vm13, %v650_v59, %v652_v4  ;;  %v657_v9 = vsel %vm655_vm13, %v652_v4, %v654_v5  ;;  %674 = vrot.lane.b32.xlu0 %v668_v0, %s934_s14 }
 0x13a   : > { %v662_v10 = vadd.f32 %v656_v8, %v611_v1  ;;  %v663_v11 = vadd.f32 %v657_v9, %v612_v2 }
 0x13c   : > { %v669_v12 = vmax.f32 %v662_v10, %v667_v58  ;;  %v670_v13 = vmax.f32 %v663_v11, %v667_v58 }
 0x13e   : > { %676 = vrot.lane.b32.xlu1 %v669_v12, %s934_s14  ;;  %678 = vrot.lane.b32.xlu0 %v670_v13, %s934_s14  ;;  %s863_s14 = scalar_lea.vmem %s1164_s20, 256 }
 0x13f   : > { %p864_p11 = scmp.ne.s32.totalorder %s1164_s20, %s863_s14  ;;  %p871_p1 = scmp.lt.s32.totalorder %s869_s30, %s863_s14 }
 0x141   : > { %p865_p12 = pnand %p864_p11, %p1006_p5  ;;  %p872_p2 = por %p871_p1, %p870_p0 }
 0x143   : > { %p866_p13 = pneg %p865_p12 }
 0x145   : > { %p873_p3 = pnand %p872_p2, %p866_p13 }
 0x1ab   : > { %v675_v14 = vpop.permute.xlu0 %674 }
 0x1b0   : > { %v677_v15 = vpop.permute.xlu1 %676  ;;  %v679_v16 = vpop.permute.xlu0 %678 }
 0x1b1   : > { %v680_v17 = vsel %vm630_vm6, %v675_v14, %v677_v15  ;;  %v681_v18 = vsel %vm630_vm6, %v677_v15, %v679_v16 }
 0x1b2   : > { %684 = vst [vmem:[%s205_s13] sm:$0xff] %v680_v17  ;;  %685 = vst [vmem:[%s205_s13 + $0x8] sm:$0xff] %v681_v18 }
 0x1b3   : > { %876 = shalt.err (!%p873_p3)
}
 0x1b4   : > { %s877_s5 = scalar_lea.hbm %s1162_s27, 256  ;;  %s881_s6 = scalar_lea.hbm %s1210_s4, 512 }
 0x1b5   : > { %p878_p4 = scmp.ne.s32.totalorder %s1162_s27, %s877_s5  ;;  %p882_p9 = scmp.lt.u32.totalorder %s1162_s27, %s1210_s4 }
 0x1b6   : > { %p883_p10 = scmp.lt.u32.totalorder %s881_s6, %s877_s5  ;;  %p885_p12 = scmp.lt.u32.totalorder %s877_s5, %s1162_s27 }
 0x1b7   : > { %p879_p7 = pnand %p878_p4, %p1006_p5 }
 0x1b8   : > { %p884_p11 = por %p883_p10, %p882_p9 }
 0x1b9   : > { %p880_p8 = pneg %p879_p7 }
 0x1ba   : > { %p886_p13 = por %p885_p12, %p884_p11 }
 0x1bc   : > { %p887_p0 = pnand %p886_p13, %p880_p8 }
 0x1be   : > { %890 = shalt.err (!%p887_p0)
}
 0x1bf   : > { %805 = dma.vmem_to_hbm [thread:$0]  (%p1006_p5), %s1164_s20, 256, %s1162_s27, %s687_s19  }
 0x1c0 PF: > { %p811_p1 = scmp.ge.s32.totalorder %s925_s18, 2  ;;  %s713_s10 = sand.u32 1, %s913_s15  }
 0x1c1   : > { %s714_s12 = scalar_lea.sflag [#allocation4], %s713_s10 }
 0x1c2   : > { %p808_p2 = pnand %p811_p1, %p1010_p6 }
 0x1c4   : > { %908 = dma.done.wait (!%p808_p2), %s714_s12, 256  }
 0x1c5   : > { %910 = vsyncadd (!%p808_p2), %s714_s12, 4294967040  ;;  %p14_p3 = scmp.ge.s32.totalorder %s993_s21, 4   ;;  %s1213_s15 = smov %s917_s16 }
 0x1c6   : > { %s1214_s16 = smov %s921_s17  ;;  %s1215_s17 = smov %s1004_s24 }
 0x1c7   : > { %s1216_s18 = smov %s993_s21  ;;  %16 = sbr.rel (!%p14_p3) target bundleno = 3 (0x3), region = 90 }
 0x1ce   :  { %719 = vsyncpa [#allocation4], 1 }
 0x1cf   :  { %721 = vsyncpa [#allocation4 + $0x1], 1 }

</bundles_post_ra>
